<compile_context>
chip_gen: v7x
topology: tpu7x:2x2x1
jax: 0.10.0
libtpu: 0.0.40
codegen_flags: <defaults>
</compile_context>

<pallas_src>
import functools

import jax
import jax.numpy as jnp
import numpy as np
from jax.experimental import pallas as pl
from jax.experimental.pallas import tpu as pltpu

LANES = 128


def _round_up(x, m):
    return ((x + m - 1) // m) * m


def _choose_batch_block(n, sz, ckpad, target=8, vmem_budget=8 * 1024 * 1024):
    """Largest divisor of n that (a) keeps the double-buffered bf16 patch block
    under vmem_budget (v7x has only 64 MiB VMEM), (b) is <= target, and
    (c) leaves >= 2 grid steps so both v7x TensorCores get work."""
    per_image = sz * ckpad * 2  # bf16 bytes per image in the patch block
    cap = max(1, vmem_budget // (2 * per_image))
    best = 1
    for b in range(1, n + 1):
        if b > target or b > cap:
            break
        if n % b:
            continue
        if n // b >= 2 or n == 1:
            best = b
    return best


# ----------------------------------------------------------------------------
# Fused kernel: conv(3x3, pad=1) + bias + ReLU + global-avg-pool + linear head
# One grid step == B images.
# ----------------------------------------------------------------------------
def _fused_kernel(patch_ref, wk_ref, b_ref, pool_ref, wh_ref, bh_ref, *out_refs):
    # patch_ref: (1, B*SZ, CKpad) bf16 im2col patches (lane-dense, zero padded)
    # wk_ref:    (CKpad, COpad)   bf16 flattened conv weight
    # b_ref:     (1, COpad)       f32 conv bias (padded)
    # pool_ref:  (B, B*SZ)        f32 block-diag 1/(H*W) pooling matrix
    # wh_ref:    (COpad, NCpad)   f32 head weight (transposed, padded)
    # bh_ref:    (1, NCpad)       f32 head bias (padded)
    # out_refs:  logits (1, B, NCpad) [, feats (1, B, COpad)]
    logits_ref = out_refs[0]
    patches = patch_ref[0]                                       # (B*SZ, CKpad)
    # Single deep-contraction conv matmul (all K*K taps and Cin folded).
    y = jnp.dot(patches, wk_ref[...], preferred_element_type=jnp.float32)
    y = jnp.maximum(y + b_ref[...], 0.0)                         # bias + ReLU
    # Global average pool over valid spatial rows of each image, on the MXU;
    # padded rows are masked by zeros in the pooling matrix.
    feats = jnp.dot(pool_ref[...], y,
                    preferred_element_type=jnp.float32)          # (B, COpad)
    logits = jnp.dot(feats, wh_ref[...],
                     preferred_element_type=jnp.float32) + bh_ref[...]
    logits_ref[0] = logits
    if len(out_refs) > 1:                                        # features=True
        out_refs[1][0] = feats


def extractor_head_forward(x, conv_w, conv_b, head_w, head_b, features=False):
    """x: (N, Cin, H, W) float32 (NCHW, like PyTorch). Returns logits [, feats]."""
    N, Cin, H, W = x.shape
    Cout, _, K, _ = conv_w.shape
    num_classes = head_w.shape[0]
    pad = K // 2
    HW = H * W
    CK = K * K * Cin
    SZ = _round_up(HW, 8)                 # spatial rows per image (sublane pad)
    CKpad = _round_up(CK, LANES)          # contraction lanes
    COpad = _round_up(Cout, LANES)
    NCpad = _round_up(num_classes, LANES)

    B = _choose_batch_block(N, SZ, CKpad)
    G = N // B
    # TODO(synk): for very large H*W add a spatial grid axis so the per-step
    # patch block stays within v7x's 64 MiB VMEM.

    # --- wrapper-side im2col (lane-dense; tiny HBM cost, feeds one matmul) ---
    xp = jnp.pad(x, ((0, 0), (0, 0), (pad, pad), (pad, pad)))
    cols = [xp[:, :, ki:ki + H, kj:kj + W] for ki in range(K) for kj in range(K)]
    patches = jnp.stack(cols, axis=1)                      # (N, K*K, Cin, H, W)
    patches = patches.transpose(0, 3, 4, 1, 2).reshape(N, HW, CK)
    patches = jnp.pad(patches, ((0, 0), (0, SZ - HW), (0, CKpad - CK)))
    patches = patches.reshape(G, B * SZ, CKpad).astype(jnp.bfloat16)

    # --- weights / bias / pooling matrix ---
    wk = conv_w.transpose(2, 3, 1, 0).reshape(CK, Cout)    # (ki,kj,ci) -> co
    wk = jnp.pad(wk, ((0, CKpad - CK), (0, COpad - Cout))).astype(jnp.bfloat16)
    b = jnp.pad(conv_b.reshape(1, Cout),
                ((0, 0), (0, COpad - Cout))).astype(jnp.float32)
    wh = jnp.pad(head_w.T, ((0, COpad - Cout),
                            (0, NCpad - num_classes))).astype(jnp.float32)
    bh = jnp.pad(head_b.reshape(1, num_classes),
                 ((0, 0), (0, NCpad - num_classes))).astype(jnp.float32)

    pool_row = jnp.where(jnp.arange(SZ) < HW, 1.0 / HW, 0.0).astype(jnp.float32)
    pool = (jnp.eye(B, dtype=jnp.float32)[:, :, None]
            * pool_row[None, None, :]).reshape(B, B * SZ)

    out_shapes = [jax.ShapeDtypeStruct((G, B, NCpad), jnp.float32)]
    out_specs = [pl.BlockSpec((1, B, NCpad), lambda g: (g, 0, 0))]
    if features:
        out_shapes.append(jax.ShapeDtypeStruct((G, B, COpad), jnp.float32))
        out_specs.append(pl.BlockSpec((1, B, COpad), lambda g: (g, 0, 0)))

    flops = N * (2 * SZ * CKpad * COpad + 2 * SZ * COpad + 2 * COpad * NCpad)
    bytes_accessed = int(2 * (patches.size + wk.size)
                         + 4 * (b.size + pool.size + wh.size + bh.size
                                + N * (NCpad + (COpad if features else 0))))

    outs = pl.pallas_call(
        _fused_kernel,
        out_shape=tuple(out_shapes),
        grid_spec=pltpu.PrefetchScalarGridSpec(
            num_scalar_prefetch=0,
            grid=(G,),
            in_specs=[
                pl.BlockSpec((1, B * SZ, CKpad), lambda g: (g, 0, 0)),
                pl.BlockSpec((CKpad, COpad), lambda g: (0, 0)),
                pl.BlockSpec((1, COpad), lambda g: (0, 0)),
                pl.BlockSpec((B, B * SZ), lambda g: (0, 0)),
                pl.BlockSpec((COpad, NCpad), lambda g: (0, 0)),
                pl.BlockSpec((1, NCpad), lambda g: (0, 0)),
            ],
            out_specs=tuple(out_specs),
        ),
        compiler_params=pltpu.CompilerParams(
            dimension_semantics=("parallel",),
            vmem_limit_bytes=32 * 1024 * 1024,
        ),
        cost_estimate=pl.CostEstimate(
            flops=flops, transcendentals=0, bytes_accessed=bytes_accessed),
    )(patches, wk, b, pool, wh, bh)

    logits = outs[0].reshape(N, NCpad)[:, :num_classes]
    if features:
        feats = outs[1].reshape(N, COpad)[:, :Cout]
        return logits, feats
    return logits


# ----------------------------------------------------------------------------
# Pure-JAX reference (for correctness check)
# ----------------------------------------------------------------------------
def _reference(x, conv_w, conv_b, head_w, head_b):
    conv = jax.lax.conv_general_dilated(
        x, conv_w, window_strides=(1, 1), padding="SAME",
        dimension_numbers=("NCHW", "OIHW", "NCHW"),
    ) + conv_b[None, :, None, None]
    conv = jnp.maximum(conv, 0.0)
    feats = jnp.mean(conv, axis=(2, 3))                   # [N, Cout]
    logits = feats @ head_w.T + head_b
    return logits, feats


if __name__ == "__main__":
    key = jax.random.PRNGKey(0)
    kx, kw, kb, khw, khb = jax.random.split(key, 5)

    N, Cin, H, W = 2, 4, 16, 16
    Cout, K, num_classes = 8, 3, 4

    x = jax.random.normal(kx, (N, Cin, H, W), dtype=jnp.float32)
    conv_w = jax.random.normal(kw, (Cout, Cin, K, K), dtype=jnp.float32) * 0.1
    conv_b = jax.random.normal(kb, (Cout,), dtype=jnp.float32) * 0.1
    head_w = jax.random.normal(khw, (num_classes, Cout), dtype=jnp.float32) * 0.1
    head_b = jax.random.normal(khb, (num_classes,), dtype=jnp.float32) * 0.1

    fwd_feats = jax.jit(functools.partial(extractor_head_forward, features=True))
    logits, feats = fwd_feats(x, conv_w, conv_b, head_w, head_b)
    jax.block_until_ready((logits, feats))

    fwd = jax.jit(extractor_head_forward)   # features=False: no feats output
    logits_only = fwd(x, conv_w, conv_b, head_w, head_b)
    jax.block_until_ready(logits_only)

    ref_logits, ref_feats = _reference(x, conv_w, conv_b, head_w, head_b)
    # bf16 MXU inputs with f32 accumulation: tolerance loosened from 1e-3.
    np.testing.assert_allclose(np.asarray(feats), np.asarray(ref_feats),
                               rtol=2e-2, atol=2e-2)
    np.testing.assert_allclose(np.asarray(logits), np.asarray(ref_logits),
                               rtol=2e-2, atol=2e-2)
    np.testing.assert_allclose(np.asarray(logits_only), np.asarray(logits),
                               rtol=1e-5, atol=1e-5)

    print("KERNEL_OK")
</pallas_src>

<mosaic_0001>
module attributes {stable_mosaic.version = 11 : i64} {
  func.func @_fused_kernel(%arg0: i32, %arg1: memref<1x256x128xbf16, #tpu.memory_space<vmem>>, %arg2: memref<128x128xbf16, #tpu.memory_space<vmem>>, %arg3: memref<1x128xf32, #tpu.memory_space<vmem>>, %arg4: memref<1x256xf32, #tpu.memory_space<vmem>>, %arg5: memref<128x128xf32, #tpu.memory_space<vmem>>, %arg6: memref<1x128xf32, #tpu.memory_space<vmem>>, %arg7: memref<1x1x128xf32, #tpu.memory_space<vmem>>, %arg8: memref<1x1x128xf32, #tpu.memory_space<vmem>>) attributes {dimension_semantics = [#tpu.dimension_semantics<parallel>], iteration_bounds = array<i64: 2>, scalar_prefetch = 0 : i64, scratch_operands = 0 : i64, tpu.core_type = #tpu.core_type<tc>, window_params = [{transform_indices = @transform_0, window_bounds = array<i64: 1, 256, 128>}, {pipeline_mode = #tpu.pipeline_mode<synchronous>, transform_indices = @transform_1, window_bounds = array<i64: 128, 128>}, {pipeline_mode = #tpu.pipeline_mode<synchronous>, transform_indices = @transform_2, window_bounds = array<i64: 1, 128>}, {pipeline_mode = #tpu.pipeline_mode<synchronous>, transform_indices = @transform_3, window_bounds = array<i64: 1, 256>}, {pipeline_mode = #tpu.pipeline_mode<synchronous>, transform_indices = @transform_4, window_bounds = array<i64: 128, 128>}, {pipeline_mode = #tpu.pipeline_mode<synchronous>, transform_indices = @transform_5, window_bounds = array<i64: 1, 128>}, {transform_indices = @transform_6, window_bounds = array<i64: 1, 1, 128>}, {transform_indices = @transform_7, window_bounds = array<i64: 1, 1, 128>}]} {
    %c0 = arith.constant 0 : index
    %c0_0 = arith.constant 0 : index
    %c0_1 = arith.constant 0 : index
    %0 = vector.load %arg1[%c0, %c0_0, %c0_1] : memref<1x256x128xbf16, #tpu.memory_space<vmem>>, vector<1x256x128xbf16>
    %1 = vector.shape_cast %0 : vector<1x256x128xbf16> to vector<256x128xbf16>
    %c0_2 = arith.constant 0 : index
    %c0_3 = arith.constant 0 : index
    %2 = vector.load %arg2[%c0_2, %c0_3] : memref<128x128xbf16, #tpu.memory_space<vmem>>, vector<128x128xbf16>
    %cst = arith.constant dense<0.000000e+00> : vector<256x128xf32>
    %3 = tpu.matmul %1, %2, %cst {dimension_numbers = #tpu.dot_dimension_numbers<[1], [0], [0], [1], [0, 0, 1, 1], [], []>} : vector<256x128xbf16>, vector<128x128xbf16>, vector<256x128xf32> -> vector<256x128xf32>
    %c0_4 = arith.constant 0 : index
    %c0_5 = arith.constant 0 : index
    %4 = vector.load %arg3[%c0_4, %c0_5] : memref<1x128xf32, #tpu.memory_space<vmem>>, vector<1x128xf32>
    %5 = vector.broadcast %4 : vector<1x128xf32> to vector<256x128xf32>
    %6 = arith.addf %3, %5 : vector<256x128xf32>
    %cst_6 = arith.constant 0.000000e+00 : f32
    %7 = vector.broadcast %cst_6 : f32 to vector<256x128xf32>
    %8 = arith.maximumf %6, %7 : vector<256x128xf32>
    %c0_7 = arith.constant 0 : index
    %c0_8 = arith.constant 0 : index
    %9 = vector.load %arg4[%c0_7, %c0_8] : memref<1x256xf32, #tpu.memory_space<vmem>>, vector<1x256xf32>
    %cst_9 = arith.constant dense<0.000000e+00> : vector<1x128xf32>
    %10 = tpu.matmul %9, %8, %cst_9 {dimension_numbers = #tpu.dot_dimension_numbers<[1], [0], [0], [1], [0, 0, 1, 1], [], []>} : vector<1x256xf32>, vector<256x128xf32>, vector<1x128xf32> -> vector<1x128xf32>
    %c0_10 = arith.constant 0 : index
    %c0_11 = arith.constant 0 : index
    %11 = vector.load %arg5[%c0_10, %c0_11] : memref<128x128xf32, #tpu.memory_space<vmem>>, vector<128x128xf32>
    %cst_12 = arith.constant dense<0.000000e+00> : vector<1x128xf32>
    %12 = tpu.matmul %10, %11, %cst_12 {dimension_numbers = #tpu.dot_dimension_numbers<[1], [0], [0], [1], [0, 0, 1, 1], [], []>} : vector<1x128xf32>, vector<128x128xf32>, vector<1x128xf32> -> vector<1x128xf32>
    %c0_13 = arith.constant 0 : index
    %c0_14 = arith.constant 0 : index
    %13 = vector.load %arg6[%c0_13, %c0_14] : memref<1x128xf32, #tpu.memory_space<vmem>>, vector<1x128xf32>
    %14 = arith.addf %12, %13 : vector<1x128xf32>
    %c0_15 = arith.constant 0 : index
    %c0_16 = arith.constant 0 : index
    %c0_17 = arith.constant 0 : index
    %15 = vector.load %arg7[%c0_15, %c0_16, %c0_17] : memref<1x1x128xf32, #tpu.memory_space<vmem>>, vector<1x1x128xf32>
    %16 = vector.shape_cast %15 : vector<1x1x128xf32> to vector<1x128xf32>
    %17 = vector.shape_cast %14 : vector<1x128xf32> to vector<1x1x128xf32>
    tpu.vector_store %arg7[%c0_15, %c0_16, %c0_17], %17 {strides = array<i32>} : memref<1x1x128xf32, #tpu.memory_space<vmem>>, vector<1x1x128xf32>,
    %c0_18 = arith.constant 0 : index
    %c0_19 = arith.constant 0 : index
    %c0_20 = arith.constant 0 : index
    %18 = vector.load %arg8[%c0_18, %c0_19, %c0_20] : memref<1x1x128xf32, #tpu.memory_space<vmem>>, vector<1x1x128xf32>
    %19 = vector.shape_cast %18 : vector<1x1x128xf32> to vector<1x128xf32>
    %20 = vector.shape_cast %10 : vector<1x128xf32> to vector<1x1x128xf32>
    tpu.vector_store %arg8[%c0_18, %c0_19, %c0_20], %20 {strides = array<i32>} : memref<1x1x128xf32, #tpu.memory_space<vmem>>, vector<1x1x128xf32>,
    return
  }
  func.func @transform_0(%arg0: i32) -> (i32, i32, i32) {
    %c0_i32 = arith.constant 0 : i32
    %c0_i32_0 = arith.constant 0 : i32
    %c0_i32_1 = arith.constant 0 : i32
    return %arg0, %c0_i32, %c0_i32_0 : i32, i32, i32
  }
  func.func @transform_1(%arg0: i32) -> (i32, i32) {
    %c0_i32 = arith.constant 0 : i32
    %c0_i32_0 = arith.constant 0 : i32
    %c0_i32_1 = arith.constant 0 : i32
    return %c0_i32, %c0_i32_0 : i32, i32
  }
  func.func @transform_2(%arg0: i32) -> (i32, i32) {
    %c0_i32 = arith.constant 0 : i32
    %c0_i32_0 = arith.constant 0 : i32
    %c0_i32_1 = arith.constant 0 : i32
    return %c0_i32, %c0_i32_0 : i32, i32
  }
  func.func @transform_3(%arg0: i32) -> (i32, i32) {
    %c0_i32 = arith.constant 0 : i32
    %c0_i32_0 = arith.constant 0 : i32
    %c0_i32_1 = arith.constant 0 : i32
    return %c0_i32, %c0_i32_0 : i32, i32
  }
  func.func @transform_4(%arg0: i32) -> (i32, i32) {
    %c0_i32 = arith.constant 0 : i32
    %c0_i32_0 = arith.constant 0 : i32
    %c0_i32_1 = arith.constant 0 : i32
    return %c0_i32, %c0_i32_0 : i32, i32
  }
  func.func @transform_5(%arg0: i32) -> (i32, i32) {
    %c0_i32 = arith.constant 0 : i32
    %c0_i32_0 = arith.constant 0 : i32
    %c0_i32_1 = arith.constant 0 : i32
    return %c0_i32, %c0_i32_0 : i32, i32
  }
  func.func @transform_6(%arg0: i32) -> (i32, i32, i32) {
    %c0_i32 = arith.constant 0 : i32
    %c0_i32_0 = arith.constant 0 : i32
    %c0_i32_1 = arith.constant 0 : i32
    return %arg0, %c0_i32, %c0_i32_0 : i32, i32, i32
  }
  func.func @transform_7(%arg0: i32) -> (i32, i32, i32) {
    %c0_i32 = arith.constant 0 : i32
    %c0_i32_0 = arith.constant 0 : i32
    %c0_i32_1 = arith.constant 0 : i32
    return %arg0, %c0_i32, %c0_i32_0 : i32, i32, i32
  }
}

</mosaic_0001>

<bundles_post_ra>
// kernel: extractor_head_forward.1
= control target key start
LH: loop header
LB: loop body
LE: loop exit
PB: predicated region body
PF: predicated region fallthrough
CT: control target
= control target key end

     0   :  { %13 = vsyncpa [#allocation3], 0  ;;  %s1718_s0 = inlined_call_operand.vmem [shape: bf16[2,256,128], index: 0, kind: input, shape index: {}]   ;;  %s1719_s1 = inlined_call_operand.vmem [shape: bf16[128,128], index: 1, kind: input, shape index: {}]   ;;  %s1720_s2 = inlined_call_operand.vmem [shape: f32[1,128], index: 2, kind: input, shape index: {}]   ;;  %s1721_s3 = inlined_call_operand.vmem [shape: f32[1,256], index: 3, kind: input, shape index: {}]   ;;  %s1722_s4 = inlined_call_operand.vmem [shape: f32[128,128], index: 4, kind: input, shape index: {}]   ;;  %s1723_s5 = inlined_call_operand.vmem [shape: f32[1,128], index: 5, kind: input, shape index: {}]   ;;  %s1724_s6 = inlined_call_operand.hbm [shape: f32[2,1,128], index: 6, kind: output, shape index: {0}]   ;;  %s1725_s7 = inlined_call_operand.hbm [shape: f32[2,1,128], index: 7, kind: output, shape index: {1}]  }
   0x1   :  { %15 = vsyncpa [#allocation3 + $0x1], 0 }
   0x2   :  { %16 = vsyncpa [#allocation5], 0 }
   0x3   :  { %18 = vsyncpa [#allocation5 + $0x1], 0  ;;  %s1426_s24 = smov 0   ;;  %s1428_s25 = smov 0  }
   0x4   :  { %s1430_s26 = smov 0   ;;  %s1432_s27 = smov 0  }
   0x5 LB: > { %s1447_s28 = sadd.s32 4294967295, %s1379_s27   ;;  %s963_s29 = sadd.s32 4294967294, %s1379_s27   ;;  %s1379_s27 = sphi %s1432_s27, %s1731_s27   ;;  %s1375_s26 = sphi %s1430_s26, %s1730_s26   ;;  %s1371_s25 = sphi %s1428_s25, %s1729_s25   ;;  %s1367_s24 = sphi %s1426_s24, %s1728_s24  }
   0x6   : > { %s1451_s30 = sadd.s32 1, %s1379_s27   ;;  %s162_s8 = sadd.s32 1, %s1375_s26 }
   0x7   : > { %s159_s9 = ssub.s32 %s1379_s27, %s1451_s30  ;;  %p172_p0 = scmp.ne.s32.totalorder %s1375_s26, %s1371_s25 }
   0x8   : > { %p160_p1 = scmp.eq.s32.totalorder %s159_s9, 0  ;;  %p173_p2 = scmp.eq.s32.totalorder %s1447_s28, 1 }
   0x9   : > { %p178_p3 = scmp.ne.s32.totalorder %s1371_s25, %s1367_s24  ;;  %p179_p4 = scmp.eq.s32.totalorder %s963_s29, 1 }
   0xa   : > { %s1462_s10 = scalar_select %p160_p1, %s1375_s26, %s162_s8  }
   0xb   : > { %p1464_p5 = por %p173_p2, %p172_p0  ;;  %p1468_p6 = por %p179_p4, %p178_p3 }
   0xc   : > { %p966_p7 = scmp.ge.s32.totalorder %s1379_s27, 1  ;;  %p246_p8 = scmp.lt.s32.totalorder %s1379_s27, 3 }
   0xe   : > { %p247_p9 = pnand %p966_p7, %p246_p8 }
   0xf   : > { %v1261_v0 = vld [vmem:[%s1719_s1] sm:$0xff] (!%p247_p9)   ;;  %p281_p10 = scmp.lt.s32.totalorder (!%p247_p9), %s1447_s28, 1  ;;  %v1262_v1 = vld [vmem:[%s1719_s1 + $0x8] sm:$0xff] (!%p247_p9)   ;;  %v1263_v2 = vld [vmem:[%s1719_s1 + $0x10] sm:$0xff] (!%p247_p9)   ;;  %v681_v24 = vlaneseq (!%p247_p9)  ;;  %vm1382_vm0 = vmmov (!%p247_p9), 0   ;;  %s1637_s14 = sand.u32 (!%p247_p9), 1, %s1371_s25  }
  0x10   : > { %250 = sbr.rel (%p247_p9) target bundleno = 776 (0x308), region = 44  ;;  %1075 = vmatprep.subr.bf16.mxu0 (!%p247_p9), %v1261_v0  ;;  %v1264_v3 = vld [vmem:[%s1719_s1 + $0x18] sm:$0xff] (!%p247_p9)   ;;  %v1265_v5 = vld [vmem:[%s1719_s1 + $0x20] sm:$0xff] (!%p247_p9)   ;;  %v1266_v6 = vld [vmem:[%s1719_s1 + $0x28] sm:$0xff] (!%p247_p9)   ;;  %s280_s15 = scalar_lea.vmem (!%p247_p9), [#allocation4], %s1637_s14 }
  0x11   : > { %1076 = vmatpush3.bf16.msra.mxu0 (!%p247_p9), %v1261_v0  ;;  %v1267_v7 = vld [vmem:[%s1719_s1 + $0x30] sm:$0xff] (!%p247_p9)   ;;  %v1268_v8 = vld [vmem:[%s1719_s1 + $0x38] sm:$0xff] (!%p247_p9)   ;;  %v682_v25 = vshrl.u32 (!%p247_p9), %v681_v24, 7  ;;  %v679_v27 = vld [vmem:[%s1721_s3] sm:$0x3] (!%p247_p9)  ;;  %s994_s16 = sshll.u32 (!%p247_p9), %s1447_s28, 4 }
  0x12   : > { %1077 = vmatprep.subr.bf16.mxu0 (!%p247_p9), %v1262_v1  ;;  %v1529_v31 = vld [vmem:[%s1720_s2] ss:$0 sm:$0xff] (!%p247_p9)  ;;  %s1646_s19 = scalar_lea.hbm (!%p247_p9), %s1725_s7, %s994_s16  ;;  %s855_s21 = scalar_lea.sflag (!%p247_p9), [#allocation5], %s1637_s14 }
  0x13   : > { %v687_v26 = vsub.s32 (!%p247_p9), 1, %v682_v25  ;;  %v683_v28 = vsub.s32 (!%p247_p9), 0, %v682_v25  ;;  %s1384_s29 = smov (!%p247_p9), [#allocation4]  }
  0x15   : > { %1078 = vmatpush3.bf16.msra.mxu0 (!%p247_p9), %v1262_v1  ;;  %v688_v29 = vrot.slane (!%p247_p9), %v679_v27, %v687_v26  ;;  %v1524_v30 = vrot.slane (!%p247_p9), %v679_v27, %v683_v28 }
  0x16   : > { %1079 = vmatprep.subr.bf16.mxu0 (!%p247_p9), %v1263_v2 }
  0x17   : > { %s282_s17 = scalar_select %p281_p10, %s1447_s28, 1  ;;  %755 = vmatprep.mubr.f32.mxu1 %v688_v29 }
  0x19   : > { %s998_s20 = sshll.u32 %s282_s17, 7  ;;  %1080 = vmatpush3.bf16.msra.mxu0 %v1263_v2 }
  0x1a   : > { %s1488_s23 = scalar_lea.vmem %s1718_s0, %s998_s20  ;;  %1081 = vmatprep.subr.bf16.mxu0 %v1264_v3  ;;  %s880_s20 = sshll.u32 %s280_s15, 4  ;;  %s881_s20 = int_to_ptr.vmem [resolvable:$true] %s880_s20 }
  0x1b   : > { %v1269_v4 = vld [vmem:[%s1488_s23] sm:$0xff]   ;;  %v1270_v9 = vld [vmem:[%s1488_s23 + $0x8] sm:$0xff]   ;;  %v1271_v10 = vld [vmem:[%s1488_s23 + $0x10] sm:$0xff]   ;;  %s1285_s22 = scalar_lea.vmem %s881_s20, 16 }
  0x1c   : > { %1091 = vmatprep.mubr.bf16.mxu0 %v1269_v4  ;;  %v1272_v11 = vld [vmem:[%s1488_s23 + $0x18] sm:$0xff]   ;;  %v1273_v12 = vld [vmem:[%s1488_s23 + $0x20] sm:$0xff]   ;;  %v1274_v13 = vld [vmem:[%s1488_s23 + $0x28] sm:$0xff]   ;;  %p1286_p11 = scmp.ne.s32.totalorder %s881_s20, %s1285_s22 }
  0x1d   : > { %1082 = vmatpush3.bf16.msra.mxu0 %v1264_v3  ;;  %v1275_v14 = vld [vmem:[%s1488_s23 + $0x30] sm:$0xff]   ;;  %v1276_v15 = vld [vmem:[%s1488_s23 + $0x38] sm:$0xff]   ;;  %v1277_v16 = vld [vmem:[%s1488_s23 + $0x40] sm:$0xff]  }
  0x1e   : > { %1083 = vmatprep.subr.bf16.mxu0 %v1265_v5  ;;  %v1278_v17 = vld [vmem:[%s1488_s23 + $0x48] sm:$0xff]   ;;  %v1279_v18 = vld [vmem:[%s1488_s23 + $0x50] sm:$0xff]   ;;  %v1280_v19 = vld [vmem:[%s1488_s23 + $0x58] sm:$0xff]   ;;  %p1287_p12 = pnand %p1286_p11, %p1464_p5 }
  0x1f   : > { %v1281_v20 = vld [vmem:[%s1488_s23 + $0x60] sm:$0xff]   ;;  %v1282_v21 = vld [vmem:[%s1488_s23 + $0x68] sm:$0xff]   ;;  %v1283_v22 = vld [vmem:[%s1488_s23 + $0x70] sm:$0xff]  }
  0x20   : > { %v1284_v23 = vld [vmem:[%s1488_s23 + $0x78] sm:$0xff]   ;;  %p1288_p13 = pneg %p1287_p12  ;;  %s1289_s23 = sshll.u32 %s1384_s29, 4  ;;  %s1290_s23 = int_to_ptr.vmem [resolvable:$false] %s1289_s23 }
  0x21   : > { %1084 = vmatpush3.bf16.msra.mxu0 %v1265_v5  ;;  %s1291_s8 = scalar_lea.vmem %s1290_s23, 32  ;;  %p1292_p0 = scmp.lt.s32.totalorder %s881_s20, %s1290_s23 }
  0x22   : > { %1085 = vmatprep.subr.bf16.mxu0 %v1266_v6  ;;  %p1293_p1 = scmp.lt.s32.totalorder %s1291_s8, %s1285_s22 }
  0x24   : > { %p1294_p2 = por %p1293_p1, %p1292_p0 }
  0x25   : > { %1086 = vmatpush3.bf16.msra.mxu0 %v1266_v6 }
  0x26   : > { %1087 = vmatprep.subr.bf16.mxu0 %v1267_v7  ;;  %p1295_p3 = pnand %p1294_p2, %p1288_p13 }
  0x29   : > { %1088 = vmatpush3.bf16.msra.mxu0 %v1267_v7 }
  0x2a   : > { %1089 = vmatprep.subr.bf16.mxu0 %v1268_v8 }
  0x2d   : > { %1090 = vmatpush3.bf16.msra.mxu0 %v1268_v8 }
  0x30   : > { %1092 = vmatmul.mubr.bf16.vlgmr.msra.gmra.mrb[0].mxu0 %v1270_v9 }
  0x31   : > { %1095 = vmatprep.mubr.bf16.mxu0 %v1271_v10 }
  0x38   : > { %1096 = vmatmul.mubr.bf16.gmra.mrb[4].mxu0 %v1272_v11 }
  0x39   : > { %1099 = vmatprep.mubr.bf16.mxu0 %v1273_v12 }
  0x40   : > { %1100 = vmatmul.mubr.bf16.gmra.mrb[8].mxu0 %v1274_v13 }
  0x41   : > { %1103 = vmatprep.mubr.bf16.mxu0 %v1275_v14 }
  0x48   : > { %1104 = vmatmul.mubr.bf16.gmra.mrb[12].mxu0 %v1276_v15 }
  0x49   : > { %1107 = vmatprep.mubr.bf16.mxu0 %v1277_v16 }
  0x50   : > { %1108 = vmatmul.mubr.bf16.gmra.mrb[16].mxu0 %v1278_v17 }
  0x51   : > { %1111 = vmatprep.mubr.bf16.mxu0 %v1279_v18 }
  0x58   : > { %1112 = vmatmul.mubr.bf16.gmra.mrb[20].mxu0 %v1280_v19 }
  0x59   : > { %1115 = vmatprep.mubr.bf16.mxu0 %v1281_v20 }
  0x60   : > { %1116 = vmatmul.mubr.bf16.gmra.mrb[24].mxu0 %v1282_v21 }
  0x61   : > { %1119 = vmatprep.mubr.bf16.mxu0 %v1283_v22 }
  0x68   : > { %1120 = vmatmul.mubr.bf16.gmra.mrb[28].mxu0 %v1284_v23 }
 0x103   : > { %v1093_v32 = vpop.f32.mrb[0].mxu0 }
 0x104   : > { %v529_v33 = vadd.f32 %v1093_v32, %v1529_v31  ;;  %v520_v34 = vpop.f32.mrb[1].mxu0 }
 0x105   : > { %v521_v35 = vadd.f32 %v1529_v31, %v520_v34  ;;  %v1094_v36 = vpop.f32.mrb[2].mxu0 }
 0x106   : > { %v532_v37 = vadd.f32 %v1094_v36, %v1529_v31  ;;  %v523_v38 = vpop.f32.mrb[3].mxu0  ;;  %v649_v40 = vmax.f32 %v529_v33, 0.0 }
 0x107   : > { %v524_v39 = vadd.f32 %v1529_v31, %v523_v38  ;;  %v647_v42 = vmax.f32 %v521_v35, 0.0 }
 0x108   : > { %v650_v41 = vmax.f32 %v532_v37, 0.0 }
 0x109   : > { %v648_v43 = vmax.f32 %v524_v39, 0.0 }
 0x10a   : > { %v1535_v44 = vpack.c.bf16 %v650_v41, %v649_v40 }
 0x10b   : > { %v1097_v45 = vpop.f32.mrb[4].mxu0  ;;  %v1537_v46 = vpack.c.bf16 %v648_v43, %v647_v42 }
 0x10c   : > { %v545_v47 = vadd.f32 %v1097_v45, %v1529_v31  ;;  %v536_v48 = vpop.f32.mrb[5].mxu0 }
 0x10d   : > { %v537_v49 = vadd.f32 %v1529_v31, %v536_v48  ;;  %v1098_v50 = vpop.f32.mrb[6].mxu0 }
 0x10e   : > { %v548_v51 = vadd.f32 %v1098_v50, %v1529_v31  ;;  %v539_v52 = vpop.f32.mrb[7].mxu0  ;;  %v653_v54 = vmax.f32 %v545_v47, 0.0 }
 0x10f   : > { %v540_v53 = vadd.f32 %v1529_v31, %v539_v52  ;;  %v651_v56 = vmax.f32 %v537_v49, 0.0 }
 0x110   : > { %v654_v55 = vmax.f32 %v548_v51, 0.0 }
 0x111   : > { %v652_v57 = vmax.f32 %v540_v53, 0.0 }
 0x112   : > { %v1543_v58 = vpack.c.bf16 %v654_v55, %v653_v54 }
 0x113   : > { %v1545_v59 = vpack.c.bf16 %v652_v57, %v651_v56  ;;  %v1101_v60 = vpop.f32.mrb[8].mxu0 }
 0x114   : > { %v561_v61 = vadd.f32 %v1101_v60, %v1529_v31  ;;  %v552_v62 = vpop.f32.mrb[9].mxu0 }
 0x115   : > { %v553_v63 = vadd.f32 %v1529_v31, %v552_v62  ;;  %v1102_v0 = vpop.f32.mrb[10].mxu0 }
 0x116   : > { %v564_v1 = vadd.f32 %v1102_v0, %v1529_v31  ;;  %v555_v2 = vpop.f32.mrb[11].mxu0  ;;  %v657_v4 = vmax.f32 %v561_v61, 0.0 }
 0x117   : > { %v556_v3 = vadd.f32 %v1529_v31, %v555_v2  ;;  %v655_v6 = vmax.f32 %v553_v63, 0.0 }
 0x118   : > { %v658_v5 = vmax.f32 %v564_v1, 0.0 }
 0x119   : > { %v656_v7 = vmax.f32 %v556_v3, 0.0 }
 0x11a   : > { %v1551_v8 = vpack.c.bf16 %v658_v5, %v657_v4 }
 0x11b   : > { %v1553_v9 = vpack.c.bf16 %v656_v7, %v655_v6  ;;  %v1105_v10 = vpop.f32.mrb[12].mxu0 }
 0x11c   : > { %v577_v11 = vadd.f32 %v1105_v10, %v1529_v31  ;;  %v568_v12 = vpop.f32.mrb[13].mxu0 }
 0x11d   : > { %v569_v13 = vadd.f32 %v1529_v31, %v568_v12  ;;  %v1106_v14 = vpop.f32.mrb[14].mxu0 }
 0x11e   : > { %v580_v15 = vadd.f32 %v1106_v14, %v1529_v31  ;;  %v571_v16 = vpop.f32.mrb[15].mxu0  ;;  %v661_v18 = vmax.f32 %v577_v11, 0.0 }
 0x11f   : > { %v572_v17 = vadd.f32 %v1529_v31, %v571_v16  ;;  %v659_v20 = vmax.f32 %v569_v13, 0.0 }
 0x120   : > { %v662_v19 = vmax.f32 %v580_v15, 0.0 }
 0x121   : > { %v660_v21 = vmax.f32 %v572_v17, 0.0 }
 0x122   : > { %v1559_v22 = vpack.c.bf16 %v662_v19, %v661_v18 }
 0x123   : > { %v1561_v23 = vpack.c.bf16 %v660_v21, %v659_v20  ;;  %v1109_v24 = vpop.f32.mrb[16].mxu0  ;;  %v761_v20 = vld [vmem:[%s1722_s4] sm:$0xff]  ;;  %v1381_v21 = vmov 0.0|0.0  }
 0x124   : > { %v593_v25 = vadd.f32 %v1109_v24, %v1529_v31  ;;  %v584_v26 = vpop.f32.mrb[17].mxu0 }
 0x125   : > { %v585_v27 = vadd.f32 %v1529_v31, %v584_v26  ;;  %v1110_v28 = vpop.f32.mrb[18].mxu0 }
 0x126   : > { %v596_v29 = vadd.f32 %v1110_v28, %v1529_v31  ;;  %v587_v32 = vpop.f32.mrb[19].mxu0  ;;  %v665_v34 = vmax.f32 %v593_v25, 0.0  ;;  %v766_v25 = vld [vmem:[%s1722_s4 + $0x28] sm:$0xff] }
 0x127   : > { %v588_v33 = vadd.f32 %v1529_v31, %v587_v32  ;;  %v663_v36 = vmax.f32 %v585_v27, 0.0  ;;  %v767_v27 = vld [vmem:[%s1722_s4 + $0x30] sm:$0xff]  ;;  %v770_v32 = vld [vmem:[%s1722_s4 + $0x48] sm:$0xff] }
 0x128   : > { %v666_v35 = vmax.f32 %v596_v29, 0.0  ;;  %v769_v29 = vld [vmem:[%s1722_s4 + $0x40] sm:$0xff] }
 0x129   : > { %v664_v37 = vmax.f32 %v588_v33, 0.0  ;;  %v1203_v33 = vpack.c.bf16 %v770_v32, %v769_v29 }
 0x12a   : > { %v1162_v38 = vpack.c.bf16 %v666_v35, %v665_v34  ;;  %v771_v34 = vld [vmem:[%s1722_s4 + $0x50] sm:$0xff]  ;;  %v772_v35 = vld [vmem:[%s1722_s4 + $0x58] sm:$0xff] }
 0x12b   : > { %v1113_v39 = vpop.f32.mrb[20].mxu0  ;;  %v1158_v40 = vpack.c.bf16 %v664_v37, %v663_v36  ;;  %v1206_v36 = vpack.c.bf16 %v772_v35, %v771_v34  ;;  %v773_v37 = vld [vmem:[%s1722_s4 + $0x60] sm:$0xff] }
 0x12c   : > { %v609_v41 = vadd.f32 %v1113_v39, %v1529_v31  ;;  %v600_v42 = vpop.f32.mrb[21].mxu0 }
 0x12d   : > { %v601_v43 = vadd.f32 %v1529_v31, %v600_v42  ;;  %v1114_v45 = vpop.f32.mrb[22].mxu0  ;;  %1159 = vmatprep.subr.bf16.mxu1 %v1158_v40  ;;  %v775_v40 = vld [vmem:[%s1722_s4 + $0x70] sm:$0xff] }
 0x12e   : > { %v612_v47 = vadd.f32 %v1114_v45, %v1529_v31  ;;  %v603_v48 = vpop.f32.mrb[23].mxu0  ;;  %1161 = vmatpush3.bf16.msra.mxu1 %v1537_v46  ;;  %v669_v50 = vmax.f32 %v609_v41, 0.0  ;;  %v776_v41 = vld [vmem:[%s1722_s4 + $0x78] sm:$0xff] }
 0x12f   : > { %v604_v49 = vadd.f32 %v1529_v31, %v603_v48  ;;  %1163 = vmatprep.subr.bf16.mxu1 %v1162_v38  ;;  %v667_v52 = vmax.f32 %v601_v43, 0.0  ;;  %v774_v38 = vld [vmem:[%s1722_s4 + $0x68] sm:$0xff]  ;;  %v1212_v42 = vpack.c.bf16 %v776_v41, %v775_v40  ;;  %v1383_v43 = vmov 0.0  }
 0x130   : > { %v670_v51 = vmax.f32 %v612_v47, 0.0  ;;  %v1209_v39 = vpack.c.bf16 %v774_v38, %v773_v37 }
 0x131   : > { %v668_v53 = vmax.f32 %v604_v49, 0.0 }
 0x132   : > { %v1170_v54 = vpack.c.bf16 %v670_v51, %v669_v50  ;;  %1165 = vmatpush3.bf16.msra.mxu1 %v1535_v44 }
 0x133   : > { %v1166_v55 = vpack.c.bf16 %v668_v53, %v667_v52  ;;  %v1117_v56 = vpop.f32.mrb[24].mxu0 }
 0x134   : > { %v625_v57 = vadd.f32 %v1117_v56, %v1529_v31  ;;  %v616_v60 = vpop.f32.mrb[25].mxu0 }
 0x135   : > { %v617_v61 = vadd.f32 %v1529_v31, %v616_v60  ;;  %v1118_v62 = vpop.f32.mrb[26].mxu0  ;;  %1167 = vmatprep.subr.bf16.mxu1 %v1166_v55 }
 0x136   : > { %v628_v46 = vadd.f32 %v1118_v62, %v1529_v31  ;;  %v619_v63 = vpop.f32.mrb[27].mxu0  ;;  %1169 = vmatpush3.bf16.msra.mxu1 %v1545_v59  ;;  %v673_v1 = vmax.f32 %v625_v57, 0.0 }
 0x137   : > { %v620_v0 = vadd.f32 %v1529_v31, %v619_v63  ;;  %1171 = vmatprep.subr.bf16.mxu1 %v1170_v54  ;;  %v671_v44 = vmax.f32 %v617_v61, 0.0 }
 0x138   : > { %v674_v2 = vmax.f32 %v628_v46, 0.0 }
 0x139   : > { %v672_v3 = vmax.f32 %v620_v0, 0.0 }
 0x13a   : > { %v1178_v4 = vpack.c.bf16 %v674_v2, %v673_v1  ;;  %1173 = vmatpush3.bf16.msra.mxu1 %v1543_v58 }
 0x13b   : > { %v1174_v5 = vpack.c.bf16 %v672_v3, %v671_v44  ;;  %v1121_v6 = vpop.f32.mrb[28].mxu0 }
 0x13c   : > { %v641_v7 = vadd.f32 %v1121_v6, %v1529_v31  ;;  %v632_v10 = vpop.f32.mrb[29].mxu0 }
 0x13d   : > { %v633_v11 = vadd.f32 %v1529_v31, %v632_v10  ;;  %v1122_v12 = vpop.f32.mrb[30].mxu0  ;;  %1175 = vmatprep.subr.bf16.mxu1 %v1174_v5 }
 0x13e   : > { %v644_v59 = vadd.f32 %v1122_v12, %v1529_v31  ;;  %v635_v13 = vpop.f32.mrb[31].mxu0  ;;  %1177 = vmatpush3.bf16.msra.mxu1 %v1553_v9  ;;  %v677_v15 = vmax.f32 %v641_v7, 0.0 }
 0x13f   : > { %v636_v14 = vadd.f32 %v1529_v31, %v635_v13  ;;  %1179 = vmatprep.subr.bf16.mxu1 %v1178_v4  ;;  %v675_v58 = vmax.f32 %v633_v11, 0.0  ;;  %v762_v31 = vld [vmem:[%s1722_s4 + $0x8] sm:$0xff] }
 0x140   : > { %v678_v16 = vmax.f32 %v644_v59, 0.0  ;;  %v1191_v9 = vpack.c.bf16 %v762_v31, %v761_v20 }
 0x141   : > { %v676_v17 = vmax.f32 %v636_v14, 0.0 }
 0x142   : > { %v1186_v18 = vpack.c.bf16 %v678_v16, %v677_v15  ;;  %1181 = vmatpush3.bf16.msra.mxu1 %v1551_v8  ;;  %v763_v8 = vld [vmem:[%s1722_s4 + $0x10] sm:$0xff] }
 0x143   : > { %v1182_v19 = vpack.c.bf16 %v676_v17, %v675_v58 }
 0x145   : > { %1183 = vmatprep.subr.bf16.mxu1 %v1182_v19 }
 0x146   : > { %1185 = vmatpush3.bf16.msra.mxu1 %v1561_v23  ;;  %v764_v23 = vld [vmem:[%s1722_s4 + $0x18] sm:$0xff] }
 0x147   : > { %1187 = vmatprep.subr.bf16.mxu1 %v1186_v18  ;;  %v1194_v24 = vpack.c.bf16 %v764_v23, %v763_v8 }
 0x14a   : > { %1189 = vmatpush3.bf16.msra.mxu1 %v1559_v22  ;;  %v765_v22 = vld [vmem:[%s1722_s4 + $0x20] sm:$0xff] }
 0x14b   : > { %1190 = vmatprep.subr.bf16.mxu1 %v1381_v21  ;;  %v1197_v26 = vpack.c.bf16 %v766_v25, %v765_v22 }
 0x14d   : > { %756 = vmatmul.mubr.f32.vlgmr.msra.gmra.mrb[0].mxu1 %v1524_v30  ;;  %v768_v30 = vld [vmem:[%s1722_s4 + $0x38] sm:$0xff] }
 0x14e   : > { %1192 = vmatpush3.bf16.msra.mxu1 %v1191_v9  ;;  %v1200_v28 = vpack.c.bf16 %v768_v30, %v767_v27  ;;  %1155 = vmatprep.mubr.msk.f32.mxu1 %vm1382_vm0, %v1383_v43 }
 0x14f   : > { %1193 = vmatprep.subr.bf16.mxu1 %v1381_v21 }
 0x152   : > { %1195 = vmatpush3.bf16.msra.mxu1 %v1194_v24 }
 0x153   : > { %1196 = vmatprep.subr.bf16.mxu1 %v1381_v21 }
 0x156   : > { %1198 = vmatpush3.bf16.msra.mxu1 %v1197_v26 }
 0x157   : > { %1199 = vmatprep.subr.bf16.mxu1 %v1381_v21 }
 0x15a   : > { %1201 = vmatpush3.bf16.msra.mxu1 %v1200_v28 }
 0x15b   : > { %1202 = vmatprep.subr.bf16.mxu1 %v1381_v21 }
 0x15e   : > { %1204 = vmatpush3.bf16.msra.mxu1 %v1203_v33 }
 0x15f   : > { %1205 = vmatprep.subr.bf16.mxu1 %v1381_v21 }
 0x162   : > { %1207 = vmatpush3.bf16.msra.mxu1 %v1206_v36 }
 0x163   : > { %1208 = vmatprep.subr.bf16.mxu1 %v1381_v21 }
 0x166   : > { %1210 = vmatpush3.bf16.msra.mxu1 %v1209_v39 }
 0x167   : > { %1211 = vmatprep.subr.bf16.mxu1 %v1381_v21 }
 0x16a   : > { %1213 = vmatpush3.bf16.msra.mxu1 %v1212_v42 }
 0x220   : > { %v1055_v45 = vpop.f32.mrb[0].mxu1 }
 0x221   : > { %v1056_v47 = vpop.f32.mrb[1].mxu1 }
 0x222   : > { %v1057_v48 = vadd.f32 %v1056_v47, %v1055_v45 }
 0x224   : > { %849 = vst [vmem:[%s280_s15] sm:$0x1] %v1057_v48  ;;  %1156 = vmatmul.mubr.f32.vlgmr.msra.gmra.mrb[2].mxu1 %v1057_v48 }
 0x225   : > { %1298 = shalt.err (!%p1295_p3)
}
 0x226   : > { %s1299_s9 = scalar_lea.hbm %s1646_s19, 16  ;;  %s1303_s17 = scalar_lea.hbm %s1725_s7, 32 }
 0x227   : > { %p1300_p4 = scmp.ne.s32.totalorder %s1646_s19, %s1299_s9  ;;  %p1304_p9 = scmp.lt.u32.totalorder %s1646_s19, %s1725_s7 }
 0x228   : > { %p1305_p10 = scmp.lt.u32.totalorder %s1303_s17, %s1299_s9  ;;  %p1307_p12 = scmp.lt.u32.totalorder %s1299_s9, %s1646_s19 }
 0x229   : > { %p1301_p7 = pnand %p1300_p4, %p1464_p5 }
 0x22a   : > { %p1306_p11 = por %p1305_p10, %p1304_p9 }
 0x22b   : > { %p1302_p8 = pneg %p1301_p7 }
 0x22c   : > { %p1308_p13 = por %p1307_p12, %p1306_p11 }
 0x22e   : > { %p1309_p0 = pnand %p1308_p13, %p1302_p8 }
 0x230   : > { %1312 = shalt.err (!%p1309_p0)
}
 0x231   : > { %1215 = dma.vmem_to_hbm [thread:$0]  (%p1464_p5), %s881_s20, 16, %s1646_s19, %s855_s21   ;;  %v777_v49 = vld [vmem:[%s1723_s5] sm:$0x1] }
 0x232   : > { %s274_s8 = scalar_lea.vmem [#allocation2], %s1637_s14  ;;  %s1675_s17 = scalar_lea.hbm %s1724_s6, %s994_s16 }
 0x233   : > { %s867_s13 = sshll.u32 %s274_s8, 4  ;;  %s851_s19 = scalar_lea.sflag [#allocation3], %s1637_s14  ;;  %s1677_s13 = int_to_ptr.vmem [resolvable:$true] %s867_s13 }
 0x234   : > { %s1313_s20 = scalar_lea.vmem %s1677_s13, 16  ;;  %s1385_s21 = smov [#allocation2]  }
 0x235   : > { %p1314_p1 = scmp.ne.s32.totalorder %s1677_s13, %s1313_s20  ;;  %s1317_s18 = sshll.u32 %s1385_s21, 4  ;;  %s1318_s18 = int_to_ptr.vmem [resolvable:$false] %s1317_s18 }
 0x236   : > { %s1319_s28 = scalar_lea.vmem %s1318_s18, 32  ;;  %p1320_p4 = scmp.lt.s32.totalorder %s1677_s13, %s1318_s18 }
 0x237   : > { %p1315_p2 = pnand %p1314_p1, %p1464_p5  ;;  %p1321_p7 = scmp.lt.s32.totalorder %s1319_s28, %s1313_s20 }
 0x239   : > { %p1316_p3 = pneg %p1315_p2  ;;  %p1322_p8 = por %p1321_p7, %p1320_p4 }
 0x23b   : > { %p1323_p9 = pnand %p1322_p8, %p1316_p3 }
 0x2f7   : > { %v844_v50 = vpop.f32.mrb[2].mxu1 }
 0x2f8   : > { %v845_v51 = vadd.f32 %v844_v50, %v777_v49  ;;  %v1157_v52 = vpop.f32.mrb[3].mxu1 }
 0x2fa   : > { %848 = vst [vmem:[%s274_s8] sm:$0x1] %v845_v51 }
 0x2fb   : > { %1326 = shalt.err (!%p1323_p9)
}
 0x2fc   : > { %s1327_s14 = scalar_lea.hbm %s1675_s17, 16  ;;  %s1331_s22 = scalar_lea.hbm %s1724_s6, 32 }
 0x2fd   : > { %p1328_p10 = scmp.ne.s32.totalorder %s1675_s17, %s1327_s14  ;;  %p1332_p13 = scmp.lt.u32.totalorder %s1675_s17, %s1724_s6 }
 0x2fe   : > { %p1333_p0 = scmp.lt.u32.totalorder %s1331_s22, %s1327_s14  ;;  %p1335_p2 = scmp.lt.u32.totalorder %s1327_s14, %s1675_s17 }
 0x2ff   : > { %p1329_p11 = pnand %p1328_p10, %p1464_p5 }
 0x300   : > { %p1334_p1 = por %p1333_p0, %p1332_p13 }
 0x301   : > { %p1330_p12 = pneg %p1329_p11 }
 0x302   : > { %p1336_p3 = por %p1335_p2, %p1334_p1 }
 0x304   : > { %p1337_p4 = pnand %p1336_p3, %p1330_p12 }
 0x306   : > { %1340 = shalt.err (!%p1337_p4)
}
 0x307   : > { %1214 = dma.vmem_to_hbm [thread:$0]  (%p1464_p5), %s1677_s13, 16, %s1675_s17, %s851_s19  }
 0x308 PF: > { %p1225_p7 = scmp.ge.s32.totalorder %s1379_s27, 2  ;;  %s892_s9 = sand.u32 1, %s1367_s24  }
 0x309   : > { %s893_s15 = scalar_lea.sflag [#allocation3], %s892_s9 }
 0x30a   : > { %p1219_p8 = pnand %p1225_p7, %p1468_p6 }
 0x30c   : > { %1358 = dma.done.wait (!%p1219_p8), %s893_s15, 16  }
 0x30d   : > { %1360 = vsyncadd (!%p1219_p8), %s893_s15, 4294967280  ;;  %s901_s20 = scalar_lea.sflag [#allocation5], %s892_s9 }
 0x30e   : > { %1362 = dma.done.wait (!%p1219_p8), %s901_s20, 16  }
 0x30f   : > { %1364 = vsyncadd (!%p1219_p8), %s901_s20, 4294967280  ;;  %p21_p5 = scmp.ge.s32.totalorder %s1451_s30, 4   ;;  %s1728_s24 = smov %s1371_s25 }
 0x310   : > { %s1729_s25 = smov %s1375_s26  ;;  %s1730_s26 = smov %s1462_s10 }
 0x311   : > { %s1731_s27 = smov %s1451_s30  ;;  %23 = sbr.rel (!%p21_p5) target bundleno = 5 (0x5), region = 96 }
 0x318   :  { %905 = vsyncpa [#allocation3], 1 }
 0x319   :  { %907 = vsyncpa [#allocation3 + $0x1], 1 }
 0x31a   :  { %908 = vsyncpa [#allocation5], 1 }
 0x31b   :  { %910 = vsyncpa [#allocation5 + $0x1], 1 }

</bundles_post_ra>
